<compile_context>
chip_gen: v7x
topology: tpu7x:2x2x1
jax: 0.10.0
libtpu: 0.0.40
codegen_flags: <defaults>
</compile_context>

<pallas_src>
import functools
import math

import jax
import jax.numpy as jnp
from jax import lax
from jax.experimental import pallas as pl
from jax.experimental.pallas import tpu as pltpu

_NEG_BIG = -1e30    # finite "-inf": avoids inf-inf NaNs in the online logsumexp
_NORM_EPS = 1e-8    # clamp on the norm (matches the pure-JAX reference / torch eps scale)


def _cluster_contrastive_kernel(
    row_ref,    # (tm, Kp)  rows of c, unit-normalized, scaled by 1/T   (resident per row block)
    col_ref,    # (Kp, tn)  pre-transposed unit-normalized c            (pipelined along axis 1)
    part_ref,   # (tm, Kp)  positive-partner rows (same scaling as row_ref)
    out_ref,    # (tm, 1)   per-row: logsumexp_{k!=i} sim[i,k] - sim[i, partner(i)]
    m_ref,      # VMEM (tm, 1): running max
    l_ref,      # VMEM (tm, 1): running sum of exp
    pos_ref,    # VMEM (tm, 1): positive logit
    *, tm, tn, c_real, c_pad, temperature,
):
    i = pl.program_id(0)
    j = pl.program_id(1)
    nj = pl.num_programs(1)

    @pl.when(j == 0)
    def _init():
        # rows and partners are both pre-scaled by 1/T -> multiply by T once to undo the square.
        a = row_ref[...].astype(jnp.float32)
        p = part_ref[...].astype(jnp.float32)
        pos_ref[...] = jnp.sum(a * p, axis=1, keepdims=True) * temperature
        m_ref[...] = jnp.full((tm, 1), _NEG_BIG, jnp.float32)
        l_ref[...] = jnp.zeros((tm, 1), jnp.float32)

    # (tm, tn) similarity tile: plain [TM,K] x [K,TN] MXU matmul, f32 accumulation.
    s = jnp.dot(row_ref[...], col_ref[...], preferred_element_type=jnp.float32)

    # Pad-column mask (static Python branch: only emitted when class_num needed padding).
    if c_pad != c_real:
        col_g = lax.broadcasted_iota(jnp.int32, (1, tn), 1) + j * tn
        pad_cols = ((col_g >= c_real) & (col_g < c_pad)) | (col_g >= c_pad + c_real)
        s = jnp.where(pad_cols, _NEG_BIG, s)

    def online_update(s_val):
        m_prev = m_ref[...]
        m_new = jnp.maximum(m_prev, jnp.max(s_val, axis=1, keepdims=True))
        l_ref[...] = l_ref[...] * jnp.exp(m_prev - m_new) + jnp.sum(
            jnp.exp(s_val - m_new), axis=1, keepdims=True)
        m_ref[...] = m_new

    # Gate the diagonal (self-similarity) mask on whether this tile touches the diagonal.
    row_lo = i * tm
    col_lo = j * tn
    overlaps_diag = jnp.logical_and(row_lo < col_lo + tn, col_lo < row_lo + tm)

    @pl.when(overlaps_diag)
    def _masked_update():
        rg = lax.broadcasted_iota(jnp.int32, (tm, 1), 0) + (row_lo - col_lo)
        cg = lax.broadcasted_iota(jnp.int32, (1, tn), 1)
        online_update(jnp.where(rg == cg, _NEG_BIG, s))

    @pl.when(jnp.logical_not(overlaps_diag))
    def _plain_update():
        online_update(s)

    @pl.when(j == nj - 1)
    def _finalize():
        out_ref[...] = m_ref[...] + jnp.log(l_ref[...]) - pos_ref[...]


def _round_up(x, m):
    return ((x + m - 1) // m) * m


def _pick_tile(size, cap, unit):
    """Largest multiple of `unit` that divides `size` (a multiple of `unit`) and is <= cap."""
    t = max(unit, min(cap, size))
    t -= t % unit
    while t > unit and size % t != 0:
        t -= unit
    return t


def cluster_loss(c_i, c_j, temperature=1.0, *, block_rows=None, block_cols=None,
                 mxu_dtype=jnp.bfloat16):
    """ClusterLoss forward: contrastive cluster loss + entropy regularizer."""
    c_i = c_i.astype(jnp.float32)
    c_j = c_j.astype(jnp.float32)
    batch, class_num = c_i.shape
    assert c_j.shape == (batch, class_num)
    assert class_num >= 2

    # ---- entropy term: plain jnp (per perf review; trivial column-sum reduction) ----------
    def neg_entropy(c):
        p = jnp.sum(c, axis=0)
        p = p / jnp.sum(p)
        return math.log(class_num) + jnp.sum(p * jnp.log(p))
    ne = neg_entropy(c_i) + neg_entropy(c_j)

    # ---- layout prep: transpose / pad / normalize ONCE (cheap O(N*batch) XLA ops) ---------
    col_cap = 2048
    c_pad = _round_up(class_num, 16)
    if 2 * c_pad > col_cap:
        c_pad = _round_up(class_num, 64)       # guarantees n_pad % 128 == 0 for a 128-mult tn
    n_pad = 2 * c_pad
    batch_pad = _round_up(batch, 128)          # lane-aligned contraction dim; zeros are no-ops

    def prep(cx):
        t = cx.T                               # (C, batch) cluster vectors as rows
        return jnp.pad(t, ((0, c_pad - class_num), (0, batch_pad - batch)))

    c = jnp.concatenate([prep(c_i), prep(c_j)], axis=0)          # (n_pad, batch_pad) f32
    norm = jnp.sqrt(jnp.sum(c * c, axis=1, keepdims=True))
    c_unit = c / jnp.maximum(norm, _NORM_EPS)                    # cosine normalization, once
    inv_temp = 1.0 / float(temperature)
    c_rows = (c_unit * inv_temp).astype(mxu_dtype)               # (n_pad, batch_pad)
    c_cols = c_unit.T.astype(mxu_dtype)                          # (batch_pad, n_pad), pre-T

    # ---- tile selection + VMEM budget -----------------------------------------------------
    tm = block_rows if block_rows is not None else _pick_tile(c_pad, 256, 16)
    if block_cols is not None:
        tn = block_cols
    elif n_pad <= col_cap:
        tn = n_pad
    else:
        tn = _pick_tile(n_pad, col_cap, 128)
    assert c_pad % tm == 0 and tm % 8 == 0
    assert n_pad % tn == 0 and (tn == n_pad or tn % 128 == 0)

    itemsize = jnp.dtype(mxu_dtype).itemsize

    def vmem_bytes(tm_, tn_):
        # double-buffered inputs (row + partner + column tiles) + output + scratch
        return (2 * (2 * tm_ * batch_pad + batch_pad * tn_) * itemsize
                + 2 * tm_ * 4 + 3 * tm_ * 4)

    if block_cols is None:
        while vmem_bytes(tm, tn) > 40 * 2**20 and tn % 256 == 0:
            tn //= 2
    if block_rows is None:
        while vmem_bytes(tm, tn) > 40 * 2**20 and tm % 32 == 0:
            tm //= 2
    vmem_limit = int(min(64 * 2**20, max(32 * 2**20, 2 * vmem_bytes(tm, tn))))

    n_row_blocks = n_pad // tm                 # always even (2 * c_pad/tm) -> v7x megacore OK
    half_blocks = c_pad // tm
    grid = (n_row_blocks, n_pad // tn)

    kernel = functools.partial(
        _cluster_contrastive_kernel,
        tm=tm, tn=tn, c_real=class_num, c_pad=c_pad, temperature=float(temperature))

    per_row = pl.pallas_call(
        kernel,
        out_shape=jax.ShapeDtypeStruct((n_pad, 1), jnp.float32),
        grid=grid,
        in_specs=[
            pl.BlockSpec((tm, batch_pad), lambda i, j: (i, 0)),                     # row tile
            pl.BlockSpec((batch_pad, tn), lambda i, j: (0, j)),                     # column tile
            pl.BlockSpec((tm, batch_pad),
                         lambda i, j: ((i + half_blocks) % n_row_blocks, 0)),       # partners
        ],
        out_specs=pl.BlockSpec((tm, 1), lambda i, j: (i, 0)),
        scratch_shapes=[
            pltpu.VMEM((tm, 1), jnp.float32),   # running max
            pltpu.VMEM((tm, 1), jnp.float32),   # running sum
            pltpu.VMEM((tm, 1), jnp.float32),   # positive logit
        ],
        compiler_params=pltpu.CompilerParams(
            dimension_semantics=("parallel", "arbitrary"),
            vmem_limit_bytes=vmem_limit),
    )(c_rows, c_cols, c_rows)

    # TODO(synk): per_row is written lane-width 1; a lane-dense (n_row_blocks, tm) output
    # layout would use unmasked stores but the absolute volume (N floats) is negligible.
    valid_row = (jnp.arange(n_pad) % c_pad) < class_num
    contrast = jnp.sum(jnp.where(valid_row, per_row[:, 0], 0.0)) / (2 * class_num)
    return contrast + ne


def _reference_cluster_loss(c_i, c_j, temperature=1.0):
    """Pure-JAX reference mirroring the PyTorch module exactly."""
    _, C = c_i.shape
    p_i = jnp.sum(c_i, axis=0); p_i = p_i / jnp.sum(p_i)
    ne_i = math.log(C) + jnp.sum(p_i * jnp.log(p_i))
    p_j = jnp.sum(c_j, axis=0); p_j = p_j / jnp.sum(p_j)
    ne_j = math.log(C) + jnp.sum(p_j * jnp.log(p_j))
    ne_loss = ne_i + ne_j

    N = 2 * C
    c = jnp.concatenate([c_i.T, c_j.T], axis=0)
    cn = c / jnp.maximum(jnp.linalg.norm(c, axis=1, keepdims=True), 1e-8)
    sim = jnp.matmul(cn, cn.T, precision=lax.Precision.HIGHEST) / temperature
    pos = jnp.concatenate(
        [jnp.diagonal(sim, offset=C), jnp.diagonal(sim, offset=-C)]).reshape(N, 1)
    mask = jnp.ones((N, N), dtype=bool)
    mask = mask.at[jnp.arange(N), jnp.arange(N)].set(False)
    idx = jnp.arange(C)
    mask = mask.at[idx, C + idx].set(False)
    mask = mask.at[C + idx, idx].set(False)
    neg = sim[mask].reshape(N, N - 2)
    logits = jnp.concatenate([pos, neg], axis=1)
    lse = jax.scipy.special.logsumexp(logits, axis=1)
    loss = jnp.sum(lse - logits[:, 0]) / N
    return loss + ne_loss


if __name__ == "__main__":
    key = jax.random.PRNGKey(0)
    k1, k2, k3, k4 = jax.random.split(key, 4)

    # Case 1: class_num = 16 (no class padding), batch = 8, T = 1.0; default bf16 MXU path,
    # single column tile, grid (2, 1).
    B, C = 8, 16
    c_i = jax.nn.softmax(jax.random.normal(k1, (B, C), jnp.float32), axis=1)
    c_j = jax.nn.softmax(jax.random.normal(k2, (B, C), jnp.float32), axis=1)
    out1 = jax.block_until_ready(cluster_loss(c_i, c_j, temperature=1.0))
    ref1 = _reference_cluster_loss(c_i, c_j, temperature=1.0)
    assert jnp.allclose(out1, ref1, rtol=5e-2, atol=5e-2), (out1, ref1)

    # Case 2: class_num = 120 (padded to 128), batch = 6 (padded to 128), T = 0.5,
    # forced 128-wide column tiles -> grid (2, 2): exercises the online-logsumexp
    # accumulation, the pad-column mask, the pl.when diagonal gating (tiles both on and
    # off the diagonal) and the partner-block wrap. Default bf16 path, loose tolerance.
    B2, C2 = 6, 120
    c_i2 = jax.nn.softmax(jax.random.normal(k3, (B2, C2), jnp.float32), axis=1)
    c_j2 = jax.nn.softmax(jax.random.normal(k4, (B2, C2), jnp.float32), axis=1)
    out2 = jax.block_until_ready(
        cluster_loss(c_i2, c_j2, temperature=0.5, block_cols=128))
    ref2 = _reference_cluster_loss(c_i2, c_j2, temperature=0.5)
    assert jnp.allclose(out2, ref2, rtol=5e-2, atol=5e-2), (out2, ref2)

    # Case 3: same inputs on the exact f32 path -> tight tolerance against the reference.
    out3 = jax.block_until_ready(
        cluster_loss(c_i2, c_j2, temperature=0.5, block_cols=128,
                     mxu_dtype=jnp.float32))
    assert jnp.allclose(out3, ref2, rtol=1e-4, atol=1e-4), (out3, ref2)

    print("KERNEL_OK")
</pallas_src>

<mosaic_0001>
module attributes {stable_mosaic.version = 11 : i64} {
  func.func @_cluster_contrastive_kernel(%arg0: i32, %arg1: i32, %arg2: memref<16x128xbf16, #tpu.memory_space<vmem>>, %arg3: memref<128x32xbf16, #tpu.memory_space<vmem>>, %arg4: memref<16x128xbf16, #tpu.memory_space<vmem>>, %arg5: memref<16x1xf32, #tpu.memory_space<vmem>>, %arg6: memref<16x1xf32, #tpu.memory_space<vmem>>, %arg7: memref<16x1xf32, #tpu.memory_space<vmem>>, %arg8: memref<16x1xf32, #tpu.memory_space<vmem>>) attributes {dimension_semantics = [#tpu.dimension_semantics<parallel>, #tpu.dimension_semantics<arbitrary>], iteration_bounds = array<i64: 2, 1>, scalar_prefetch = 0 : i64, scratch_operands = 3 : i64, tpu.core_type = #tpu.core_type<tc>, window_params = [{transform_indices = @transform_0, window_bounds = array<i64: 16, 128>}, {transform_indices = @transform_1, window_bounds = array<i64: 128, 32>}, {transform_indices = @transform_2, window_bounds = array<i64: 16, 128>}, {transform_indices = @transform_3, window_bounds = array<i64: 16, 1>}]} {
    %c0_i32 = arith.constant 0 : i32
    %0 = arith.cmpi eq, %arg1, %c0_i32 : i32
    %1 = arith.extui %0 : i1 to i32
    %c0_i32_0 = arith.constant 0 : i32
    %2 = arith.cmpi ne, %1, %c0_i32_0 : i32
    scf.if %2 {
      %c0_10 = arith.constant 0 : index
      %c0_11 = arith.constant 0 : index
      %21 = vector.load %arg2[%c0_10, %c0_11] : memref<16x128xbf16, #tpu.memory_space<vmem>>, vector<16x128xbf16>
      %22 = arith.extf %21 : vector<16x128xbf16> to vector<16x128xf32>
      %c0_12 = arith.constant 0 : index
      %c0_13 = arith.constant 0 : index
      %23 = vector.load %arg4[%c0_12, %c0_13] : memref<16x128xbf16, #tpu.memory_space<vmem>>, vector<16x128xbf16>
      %24 = arith.extf %23 : vector<16x128xbf16> to vector<16x128xf32>
      %25 = arith.mulf %22, %24 : vector<16x128xf32>
      %cst_14 = arith.constant dense<0.000000e+00> : vector<16xf32>
      %26 = vector.multi_reduction <add>, %25, %cst_14 [1] : vector<16x128xf32> to vector<16xf32>
      %27 = vector.shape_cast %26 : vector<16xf32> to vector<16x1xf32>
      %cst_15 = arith.constant 1.000000e+00 : f32
      %28 = vector.broadcast %cst_15 : f32 to vector<16x1xf32>
      %29 = arith.mulf %27, %28 : vector<16x1xf32>
      %c0_16 = arith.constant 0 : index
      %c0_17 = arith.constant 0 : index
      %30 = vector.load %arg8[%c0_16, %c0_17] : memref<16x1xf32, #tpu.memory_space<vmem>>, vector<16x1xf32>
      tpu.vector_store %arg8[%c0_16, %c0_17], %29 {strides = array<i32>} : memref<16x1xf32, #tpu.memory_space<vmem>>, vector<16x1xf32>,
      %cst_18 = arith.constant -1.000000e+30 : f32
      %31 = vector.broadcast %cst_18 : f32 to vector<16x1xf32>
      %c0_19 = arith.constant 0 : index
      %c0_20 = arith.constant 0 : index
      %32 = vector.load %arg6[%c0_19, %c0_20] : memref<16x1xf32, #tpu.memory_space<vmem>>, vector<16x1xf32>
      tpu.vector_store %arg6[%c0_19, %c0_20], %31 {strides = array<i32>} : memref<16x1xf32, #tpu.memory_space<vmem>>, vector<16x1xf32>,
      %cst_21 = arith.constant 0.000000e+00 : f32
      %33 = vector.broadcast %cst_21 : f32 to vector<16x1xf32>
      %c0_22 = arith.constant 0 : index
      %c0_23 = arith.constant 0 : index
      %34 = vector.load %arg7[%c0_22, %c0_23] : memref<16x1xf32, #tpu.memory_space<vmem>>, vector<16x1xf32>
      tpu.vector_store %arg7[%c0_22, %c0_23], %33 {strides = array<i32>} : memref<16x1xf32, #tpu.memory_space<vmem>>, vector<16x1xf32>,
    } else {
    }
    %c0 = arith.constant 0 : index
    %c0_1 = arith.constant 0 : index
    %3 = vector.load %arg2[%c0, %c0_1] : memref<16x128xbf16, #tpu.memory_space<vmem>>, vector<16x128xbf16>
    %c0_2 = arith.constant 0 : index
    %c0_3 = arith.constant 0 : index
    %4 = vector.load %arg3[%c0_2, %c0_3] : memref<128x32xbf16, #tpu.memory_space<vmem>>, vector<128x32xbf16>
    %cst = arith.constant dense<0.000000e+00> : vector<16x32xf32>
    %5 = tpu.matmul %3, %4, %cst {dimension_numbers = #tpu.dot_dimension_numbers<[1], [0], [0], [1], [0, 0, 1, 1], [], []>} : vector<16x128xbf16>, vector<128x32xbf16>, vector<16x32xf32> -> vector<16x32xf32>
    %c16_i32 = arith.constant 16 : i32
    %6 = arith.muli %arg0, %c16_i32 : i32
    %c32_i32 = arith.constant 32 : i32
    %7 = arith.muli %arg1, %c32_i32 : i32
    %c32_i32_4 = arith.constant 32 : i32
    %8 = arith.addi %7, %c32_i32_4 : i32
    %9 = arith.cmpi slt, %6, %8 : i32
    %c16_i32_5 = arith.constant 16 : i32
    %10 = arith.addi %6, %c16_i32_5 : i32
    %11 = arith.cmpi slt, %7, %10 : i32
    %12 = arith.andi %9, %11 : i1
    %13 = arith.extui %12 : i1 to i32
    %c0_i32_6 = arith.constant 0 : i32
    %14 = arith.cmpi ne, %13, %c0_i32_6 : i32
    scf.if %14 {
      %21 = tpu.iota {dimensions = array<i32: 0>} : vector<16x1xi32>
      %22 = arith.subi %6, %7 : i32
      %23 = vector.broadcast %22 : i32 to vector<16x1xi32>
      %24 = arith.addi %21, %23 : vector<16x1xi32>
      %25 = tpu.iota {dimensions = array<i32: 1>} : vector<1x32xi32>
      %26 = vector.broadcast %24 : vector<16x1xi32> to vector<16x32xi32>
      %27 = vector.broadcast %25 : vector<1x32xi32> to vector<16x32xi32>
      %28 = arith.cmpi eq, %26, %27 : vector<16x32xi32>
      %cst_10 = arith.constant -1.000000e+30 : f32
      %29 = vector.broadcast %cst_10 : f32 to vector<16x32xf32>
      %30 = arith.select %28, %29, %5 : vector<16x32xi1>, vector<16x32xf32>
      %c0_11 = arith.constant 0 : index
      %c0_12 = arith.constant 0 : index
      %31 = vector.load %arg6[%c0_11, %c0_12] : memref<16x1xf32, #tpu.memory_space<vmem>>, vector<16x1xf32>
      %cst_13 = arith.constant dense<0xFF800000> : vector<16xf32>
      %32 = vector.multi_reduction <maximumf>, %30, %cst_13 [1] : vector<16x32xf32> to vector<16xf32>
      %33 = vector.shape_cast %32 : vector<16xf32> to vector<16x1xf32>
      %34 = arith.maximumf %31, %33 : vector<16x1xf32>
      %c0_14 = arith.constant 0 : index
      %c0_15 = arith.constant 0 : index
      %35 = vector.load %arg7[%c0_14, %c0_15] : memref<16x1xf32, #tpu.memory_space<vmem>>, vector<16x1xf32>
      %36 = arith.subf %31, %34 : vector<16x1xf32>
      %37 = math.exp %36 : vector<16x1xf32>
      %38 = arith.mulf %35, %37 : vector<16x1xf32>
      %39 = vector.broadcast %34 : vector<16x1xf32> to vector<16x32xf32>
      %40 = arith.subf %30, %39 : vector<16x32xf32>
      %41 = math.exp %40 : vector<16x32xf32>
      %cst_16 = arith.constant dense<0.000000e+00> : vector<16xf32>
      %42 = vector.multi_reduction <add>, %41, %cst_16 [1] : vector<16x32xf32> to vector<16xf32>
      %43 = vector.shape_cast %42 : vector<16xf32> to vector<16x1xf32>
      %44 = arith.addf %38, %43 : vector<16x1xf32>
      %c0_17 = arith.constant 0 : index
      %c0_18 = arith.constant 0 : index
      %45 = vector.load %arg7[%c0_17, %c0_18] : memref<16x1xf32, #tpu.memory_space<vmem>>, vector<16x1xf32>
      tpu.vector_store %arg7[%c0_17, %c0_18], %44 {strides = array<i32>} : memref<16x1xf32, #tpu.memory_space<vmem>>, vector<16x1xf32>,
      %c0_19 = arith.constant 0 : index
      %c0_20 = arith.constant 0 : index
      %46 = vector.load %arg6[%c0_19, %c0_20] : memref<16x1xf32, #tpu.memory_space<vmem>>, vector<16x1xf32>
      tpu.vector_store %arg6[%c0_19, %c0_20], %34 {strides = array<i32>} : memref<16x1xf32, #tpu.memory_space<vmem>>, vector<16x1xf32>,
    } else {
    }
    %true = arith.constant true
    %15 = arith.xori %12, %true : i1
    %16 = arith.extui %15 : i1 to i32
    %c0_i32_7 = arith.constant 0 : i32
    %17 = arith.cmpi ne, %16, %c0_i32_7 : i32
    scf.if %17 {
      %c0_10 = arith.constant 0 : index
      %c0_11 = arith.constant 0 : index
      %21 = vector.load %arg6[%c0_10, %c0_11] : memref<16x1xf32, #tpu.memory_space<vmem>>, vector<16x1xf32>
      %cst_12 = arith.constant dense<0xFF800000> : vector<16xf32>
      %22 = vector.multi_reduction <maximumf>, %5, %cst_12 [1] : vector<16x32xf32> to vector<16xf32>
      %23 = vector.shape_cast %22 : vector<16xf32> to vector<16x1xf32>
      %24 = arith.maximumf %21, %23 : vector<16x1xf32>
      %c0_13 = arith.constant 0 : index
      %c0_14 = arith.constant 0 : index
      %25 = vector.load %arg7[%c0_13, %c0_14] : memref<16x1xf32, #tpu.memory_space<vmem>>, vector<16x1xf32>
      %26 = arith.subf %21, %24 : vector<16x1xf32>
      %27 = math.exp %26 : vector<16x1xf32>
      %28 = arith.mulf %25, %27 : vector<16x1xf32>
      %29 = vector.broadcast %24 : vector<16x1xf32> to vector<16x32xf32>
      %30 = arith.subf %5, %29 : vector<16x32xf32>
      %31 = math.exp %30 : vector<16x32xf32>
      %cst_15 = arith.constant dense<0.000000e+00> : vector<16xf32>
      %32 = vector.multi_reduction <add>, %31, %cst_15 [1] : vector<16x32xf32> to vector<16xf32>
      %33 = vector.shape_cast %32 : vector<16xf32> to vector<16x1xf32>
      %34 = arith.addf %28, %33 : vector<16x1xf32>
      %c0_16 = arith.constant 0 : index
      %c0_17 = arith.constant 0 : index
      %35 = vector.load %arg7[%c0_16, %c0_17] : memref<16x1xf32, #tpu.memory_space<vmem>>, vector<16x1xf32>
      tpu.vector_store %arg7[%c0_16, %c0_17], %34 {strides = array<i32>} : memref<16x1xf32, #tpu.memory_space<vmem>>, vector<16x1xf32>,
      %c0_18 = arith.constant 0 : index
      %c0_19 = arith.constant 0 : index
      %36 = vector.load %arg6[%c0_18, %c0_19] : memref<16x1xf32, #tpu.memory_space<vmem>>, vector<16x1xf32>
      tpu.vector_store %arg6[%c0_18, %c0_19], %24 {strides = array<i32>} : memref<16x1xf32, #tpu.memory_space<vmem>>, vector<16x1xf32>,
    } else {
    }
    %c0_i32_8 = arith.constant 0 : i32
    %18 = arith.cmpi eq, %arg1, %c0_i32_8 : i32
    %19 = arith.extui %18 : i1 to i32
    %c0_i32_9 = arith.constant 0 : i32
    %20 = arith.cmpi ne, %19, %c0_i32_9 : i32
    scf.if %20 {
      %c0_10 = arith.constant 0 : index
      %c0_11 = arith.constant 0 : index
      %21 = vector.load %arg6[%c0_10, %c0_11] : memref<16x1xf32, #tpu.memory_space<vmem>>, vector<16x1xf32>
      %c0_12 = arith.constant 0 : index
      %c0_13 = arith.constant 0 : index
      %22 = vector.load %arg7[%c0_12, %c0_13] : memref<16x1xf32, #tpu.memory_space<vmem>>, vector<16x1xf32>
      %23 = math.log %22 : vector<16x1xf32>
      %24 = arith.addf %21, %23 : vector<16x1xf32>
      %c0_14 = arith.constant 0 : index
      %c0_15 = arith.constant 0 : index
      %25 = vector.load %arg8[%c0_14, %c0_15] : memref<16x1xf32, #tpu.memory_space<vmem>>, vector<16x1xf32>
      %26 = arith.subf %24, %25 : vector<16x1xf32>
      %c0_16 = arith.constant 0 : index
      %c0_17 = arith.constant 0 : index
      %27 = vector.load %arg5[%c0_16, %c0_17] : memref<16x1xf32, #tpu.memory_space<vmem>>, vector<16x1xf32>
      tpu.vector_store %arg5[%c0_16, %c0_17], %26 {strides = array<i32>} : memref<16x1xf32, #tpu.memory_space<vmem>>, vector<16x1xf32>,
    } else {
    }
    return
  }
  func.func @transform_0(%arg0: i32, %arg1: i32) -> (i32, i32) {
    %c0_i32 = arith.constant 0 : i32
    %c0_i32_0 = arith.constant 0 : i32
    return %arg0, %c0_i32 : i32, i32
  }
  func.func @transform_1(%arg0: i32, %arg1: i32) -> (i32, i32) {
    %c0_i32 = arith.constant 0 : i32
    %c0_i32_0 = arith.constant 0 : i32
    return %c0_i32, %arg1 : i32, i32
  }
  func.func @transform_2(%arg0: i32, %arg1: i32) -> (i32, i32) {
    %c1_i32 = arith.constant 1 : i32
    %0 = arith.addi %arg0, %c1_i32 : i32
    %c2_i32 = arith.constant 2 : i32
    %c0_i32 = arith.constant 0 : i32
    %1 = arith.cmpi eq, %c2_i32, %c0_i32 : i32
    %c1_i32_0 = arith.constant 1 : i32
    %2 = arith.select %1, %c1_i32_0, %c2_i32 : i32
    %3 = arith.remsi %0, %2 : i32
    %c0_i32_1 = arith.constant 0 : i32
    %4 = arith.cmpi ne, %3, %c0_i32_1 : i32
    %c0_i32_2 = arith.constant 0 : i32
    %5 = arith.cmpi slt, %3, %c0_i32_2 : i32
    %c0_i32_3 = arith.constant 0 : i32
    %6 = arith.cmpi slt, %2, %c0_i32_3 : i32
    %7 = arith.xori %5, %6 : i1
    %8 = arith.andi %7, %4 : i1
    %9 = arith.addi %3, %2 : i32
    %10 = arith.select %8, %9, %3 : i32
    %c0_i32_4 = arith.constant 0 : i32
    %c0_i32_5 = arith.constant 0 : i32
    return %10, %c0_i32_4 : i32, i32
  }
  func.func @transform_3(%arg0: i32, %arg1: i32) -> (i32, i32) {
    %c0_i32 = arith.constant 0 : i32
    %c0_i32_0 = arith.constant 0 : i32
    return %arg0, %c0_i32 : i32, i32
  }
}

</mosaic_0001>

<bundles_post_ra>
// kernel: tpu_custom_call.1
= control target key start
LH: loop header
LB: loop body
LE: loop exit
PB: predicated region body
PF: predicated region fallthrough
CT: control target
= control target key end

     0   :  { %s875_s12 = smov 0   ;;  %s877_s13 = smov 0   ;;  %s991_s0 = inlined_call_operand.vmem [shape: bf16[32,128], index: 0, kind: input, shape index: {}]   ;;  %s992_s1 = inlined_call_operand.vmem [shape: bf16[128,32], index: 1, kind: input, shape index: {}]   ;;  %s993_s2 = inlined_call_operand.vmem [shape: bf16[32,128], index: 2, kind: input, shape index: {}]   ;;  %s994_s3 = inlined_call_operand.vmem [shape: f32[32,1], index: 3, kind: output, shape index: {}]  }
   0x1   :  { %s879_s14 = smov 0  }
   0x2 LB: > { %s25_s15 = sadd.s32 1, %s844_s13  ;;  %p704_p0 = scmp.ge.s32.totalorder %s848_s14, 1  ;;  %s848_s14 = sphi %s879_s14, %s13_s14   ;;  %s844_s13 = sphi %s877_s13, %s997_s13   ;;  %s840_s12 = sphi %s875_s12, %s996_s12  }
   0x3   : > { %p27_p1 = scmp.ge.s32.totalorder %s25_s15, 2  ;;  %p222_p2 = scmp.lt.s32.totalorder %s848_s14, 3 }
   0x5   : > { %s999_s15 = smov (%p27_p1, %s25_s15), 0  ;;  %p223_p3 = pnand %p704_p0, %p222_p2 }
   0x6   : > { %v793_v0 = vld [vmem:[%s992_s1] sm:$0xff] (!%p223_p3)   ;;  %v850_v1 = vmov (!%p223_p3), 0.0   ;;  %v794_v2 = vld [vmem:[%s992_s1 + $0x8] sm:$0xff] (!%p223_p3)   ;;  %vm851_vm0 = vmmov (!%p223_p3), 0   ;;  %s705_s20 = sshll.u32 (!%p223_p3), %s840_s12, 1  ;;  %v795_v3 = vld [vmem:[%s992_s1 + $0x10] sm:$0xff] (!%p223_p3)  }
   0x7   : > { %226 = sbr.rel (%p223_p3) target bundleno = 1154 (0x482), region = 32  ;;  %744 = vmatprep.subr.bf16.mxu0 (!%p223_p3), %v850_v1  ;;  %760 = vmatprep.mubr.msk.bf16.mxu0 (!%p223_p3), %vm851_vm0, %v850_v1  ;;  %p269_p4 = scmp.lt.s32.totalorder (!%p223_p3), %s705_s20, 3  ;;  %vm335_vm1 = vcmask (!%p223_p3), 7168   ;;  %v852_v4 = vmov (!%p223_p3), -1e+30   ;;  %v796_v5 = vld [vmem:[%s992_s1 + $0x18] sm:$0xff] (!%p223_p3)  }
   0x8   : > { %745 = vmatpush3.bf16.msra.mxu0 (!%p223_p3), %v793_v0  ;;  %s278_s23 = sadd.s32 (!%p223_p3), 1, %s840_s12  ;;  %338 = vst.msk [vmem:[#allocation2] sm:$0xff] (!%p223_p3), %vm335_vm1, %v852_v4  ;;  %339 = vst.msk [vmem:[#allocation2 + $0x8] sm:$0xff] (!%p223_p3), %vm335_vm1, %v852_v4  ;;  %v797_v6 = vld [vmem:[%s992_s1 + $0x20] sm:$0xff] (!%p223_p3)   ;;  %v798_v7 = vld [vmem:[%s992_s1 + $0x28] sm:$0xff] (!%p223_p3)   ;;  %s723_s30 = sshll.u32 (!%p223_p3), %s840_s12, 4 }
   0x9   : > { %746 = vmatprep.subr.bf16.mxu0 (!%p223_p3), %v850_v1  ;;  %p279_p5 = scmp.lt.s32.totalorder (!%p223_p3), %s278_s23, 0  ;;  %s280_s5 = ssub.s32 (!%p223_p3), 0, %s278_s23  ;;  %340 = vst.msk [vmem:[#allocation3] sm:$0xff] (!%p223_p3), %vm335_vm1, %v850_v1  ;;  %341 = vst.msk [vmem:[#allocation3 + $0x8] sm:$0xff] (!%p223_p3), %vm335_vm1, %v850_v1  ;;  %v799_v8 = vld [vmem:[%s992_s1 + $0x30] sm:$0xff] (!%p223_p3)   ;;  %v800_v11 = vld [vmem:[%s992_s1 + $0x38] sm:$0xff] (!%p223_p3)  }
   0xa   : > { %s707_s8 = smin.u32 (!%p223_p3), %s280_s5, %s278_s23  ;;  %s459_s5 = sadd.s32 (!%p223_p3), 16, %s723_s30 }
   0xb   : > { %s282_s9 = sand.u32 (!%p223_p3), 1, %s707_s8   ;;  %p458_p8 = scmp.lt.s32.totalorder (!%p223_p3), %s723_s30, 32 }
   0xc   : > { %747 = vmatpush3.bf16.msra.mxu0 (!%p223_p3), %v794_v2  ;;  %s283_s10 = ssub.s32 (!%p223_p3), 0, %s282_s9  ;;  %p724_p9 = scmp.gt.s32.totalorder (!%p223_p3), %s459_s5, 0 }
   0xd   : > { %748 = vmatprep.subr.bf16.mxu0 (!%p223_p3), %v850_v1 }
   0xe   : > { %s1001_s20 = smov (!%p269_p4, %s705_s20), 3  ;;  %s1003_s10 = smov (!%p279_p5, %s283_s10), %s282_s9 }
   0xf   : > { %s706_s24 = sshll.u32 %s1001_s20, 2  ;;  %s713_s28 = sshll.u32 %s1001_s20, 3 }
  0x10   : > { %s909_s27 = scalar_lea.vmem %s991_s0, %s706_s24  ;;  %s914_s4 = scalar_lea.vmem %s994_s3, %s713_s28  ;;  %749 = vmatpush3.bf16.msra.mxu0 %v795_v3 }
  0x11   : > { %750 = vmatprep.subr.bf16.mxu0 %v850_v1  ;;  %p709_p6 = scmp.lt.s32.totalorder %s1003_s10, 0  ;;  %s289_s17 = sadd.s32 2, %s1003_s10  ;;  %v728_v9 = vld [vmem:[%s909_s27] sm:$0xff]  }
  0x12   : > { %v729_v10 = vunpack.c.l.bf16 %v728_v9  ;;  %v730_v14 = vunpack.c.h.bf16 %v728_v9  ;;  %v801_v16 = vld [vmem:[%s909_s27] sm:$0xff]   ;;  %p942_p10 = pnand %p724_p9, %p458_p8 }
  0x13   : > { %s1005_s17 = smov (!%p709_p6, %s289_s17), %s1003_s10  ;;  %v465_v25 = vlaneseq (!%p942_p10)  ;;  %v469_v26 = vstv (!%p942_p10), %s723_s30  ;;  %vm480_vm2 = vcmask (!%p942_p10), 261120   ;;  %v853_v36 = vmov (!%p942_p10), 0   ;;  %v478_v37 = vld [vmem:[#allocation2] sm:$0xff] (!%p942_p10)  ;;  %v479_v40 = vld [vmem:[#allocation2 + $0x8] sm:$0xff] (!%p942_p10)  ;;  %v489_v58 = vld [vmem:[#allocation3] sm:$0xff] (!%p942_p10) }
  0x14   : > { %751 = vmatpush3.bf16.msra.mxu0 %v796_v5  ;;  %s710_s20 = sshll.u32 %s1005_s17, 1  ;;  %802 = vset.pattern.permute.xlu1 (!%p942_p10), %v853_v36  ;;  %v490_v62 = vld [vmem:[#allocation3 + $0x8] sm:$0xff] (!%p942_p10) }
  0x15   : > { %752 = vmatprep.subr.bf16.mxu0 %v850_v1  ;;  %p292_p7 = scmp.lt.s32.totalorder %s710_s20, 3  ;;  %v466_v27 = vshrl.u32 (!%p942_p10), %v465_v25, 7  ;;  %v473_v28 = vand.u32 (!%p942_p10), 127, %v465_v25  ;;  %803 = vset.pattern.permute.xlu0 (!%p942_p10), %v853_v36 }
  0x17   : > { %s1007_s20 = smov (!%p292_p7, %s710_s20), 3  ;;  %v470_v29 = vadd.s32 (!%p942_p10), %v469_v26, %v466_v27  ;;  %v467_v30 = vadd.s32 (!%p942_p10), 8, %v466_v27 }
  0x18   : > { %753 = vmatpush3.bf16.msra.mxu0 %v797_v6  ;;  %s711_s23 = sshll.u32 %s1007_s20, 2 }
  0x19   : > { %754 = vmatprep.subr.bf16.mxu0 %v850_v1  ;;  %s295_s26 = scalar_lea.vmem %s993_s2, %s711_s23  ;;  %vm474_vm3 = vcmp.eq.s32.totalorder (!%p942_p10), %v470_v29, %v473_v28  ;;  %v471_v31 = vadd.s32 (!%p942_p10), %v469_v26, %v467_v30 }
  0x1a   : > { %v732_v12 = vld [vmem:[%s295_s26] sm:$0xff]  }
  0x1b   : > { %v733_v13 = vunpack.c.l.bf16 %v732_v12  ;;  %v734_v15 = vunpack.c.h.bf16 %v732_v12  ;;  %vm475_vm4 = vcmp.eq.s32.totalorder (!%p942_p10), %v471_v31, %v473_v28 }
  0x1c   : > { %755 = vmatpush3.bf16.msra.mxu0 %v798_v7 }
  0x1d   : > { %756 = vmatprep.subr.bf16.mxu0 %v850_v1  ;;  %v329_v17 = vmul.f32 %v733_v13, %v729_v10  ;;  %v330_v18 = vmul.f32 %v734_v15, %v730_v14 }
  0x1f   : > { %331 = vadd.xlane.f32.xlu0 %v329_v17 }
  0x20   : > { %757 = vmatpush3.bf16.msra.mxu0 %v799_v8 }
  0x21   : > { %758 = vmatprep.subr.bf16.mxu0 %v850_v1 }
  0x23   : > { %333 = vadd.xlane.f32.xlu0 %v330_v18 }
  0x24   : > { %759 = vmatpush3.bf16.msra.mxu0 %v800_v11 }
  0x27   : > { %761 = vmatmul.mubr.bf16.vlgmr.msra.gmra.mrb[0].mxu0 %v801_v16 }
  0xac   : > { %v332_v19 = vpop.xlane.xlu0 %331 }
  0xad   : > { %336 = vst.msk [vmem:[#allocation4] sm:$0xff] %vm335_vm1, %v332_v19 }
  0xb0   : > { %v334_v20 = vpop.xlane.xlu0 %333 }
  0xb1   : > { %337 = vst.msk [vmem:[#allocation4 + $0x8] sm:$0xff] %vm335_vm1, %v334_v20 }
  0xf7   : > { %464 = sbr.rel (%p942_p10) target bundleno = 690 (0x2b2), region = 40 }
  0xfa   : > { %v948_v21 = vpop.f32.mrb[0].mxu0 }
  0xfb   : > { %v762_v22 = vpop.f32.mrb[1].mxu0  ;;  %v476_v32 = vsel (!%p942_p10), %vm474_vm3, -1e+30, %v948_v21 }
  0xfc   : > { %v950_v23 = vpop.f32.mrb[2].mxu0  ;;  %v481_v33 = vsel (!%p942_p10), %vm480_vm2, %v476_v32, -inf }
  0xfd   : > { %v763_v24 = vpop.f32.mrb[3].mxu0  ;;  %482 = vmax.xlane.f32.xlu0 (!%p942_p10), %v481_v33  ;;  %v477_v34 = vsel (!%p942_p10), %vm475_vm4, -1e+30, %v950_v23 }
  0xfe   : > { %v484_v35 = vsel %vm480_vm2, %v477_v34, -inf }
 0x101   : > { %485 = vmax.xlane.f32.xlu0 %v484_v35 }
 0x18a   : > { %v483_v38 = vpop.xlane.xlu0 %482 }
 0x18b   : > { %v487_v39 = vmax.f32 %v478_v37, %v483_v38 }
 0x18d   : > { %v491_v41 = vsub.f32 %v478_v37, %v487_v39  ;;  %526 = vst.msk [vmem:[#allocation2] sm:$0xff] %vm335_vm1, %v487_v39  ;;  %501 = vperm.xlu1 %802, %v487_v39  }
 0x18e   : > { %v486_v42 = vpop.xlane.xlu0 %485 }
 0x18f   : > { %v488_v43 = vmax.f32 %v479_v40, %v486_v42  ;;  %v493_v55 = vmul.f32 1.442695, %v491_v41 }
 0x191   : > { %v492_v44 = vsub.f32 %v479_v40, %v488_v43  ;;  %527 = vst.msk [vmem:[#allocation2 + $0x8] sm:$0xff] %vm335_vm1, %v488_v43  ;;  %506 = vperm.xlu1 %802, %v488_v43  }
 0x193   : > { %v495_v56 = vmul.f32 1.442695, %v492_v44 }
 0x20c   : > { %v502_v45 = vpop.permute.xlu1 %501 }
 0x20d   : > { %v509_v46 = vsub.f32 %v476_v32, %v502_v45 }
 0x20f   : > { %v511_v47 = vmul.f32 1.442695, %v509_v46 }
 0x210   : > { %v507_v48 = vpop.permute.xlu1 %506 }
 0x211   : > { %804 = vpow2.f32 %v511_v47  ;;  %v510_v49 = vsub.f32 %v477_v34, %v507_v48 }
 0x213   : > { %v513_v50 = vmul.f32 1.442695, %v510_v49 }
 0x215   : > { %806 = vpow2.f32 %v513_v50 }
 0x216   : > { %808 = vpow2.f32 %v493_v55 }
 0x217   : > { %810 = vpow2.f32 %v495_v56 }
 0x21b   : > { %v805_v51 = vpop.eup %804 }
 0x21c   : > { %v515_v52 = vsel %vm480_vm2, %v805_v51, 0.0 }
 0x21d   : > { %516 = vadd.xlane.f32.xlu0 %v515_v52 }
 0x21f   : > { %v807_v53 = vpop.eup %806 }
 0x220   : > { %v518_v54 = vsel %vm480_vm2, %v807_v53, 0.0  ;;  %v809_v57 = vpop.eup %808 }
 0x221   : > { %519 = vadd.xlane.f32.xlu1 %v518_v54  ;;  %v497_v59 = vmul.f32 %v809_v57, %v489_v58  ;;  %v811_v60 = vpop.eup %810 }
 0x222   : > { %v498_v0 = vmul.f32 %v811_v60, %v490_v62 }
 0x2aa   : > { %v517_v61 = vpop.xlane.xlu0 %516 }
 0x2ab   : > { %v521_v63 = vadd.f32 %v517_v61, %v497_v59 }
 0x2ad   : > { %524 = vst.msk [vmem:[#allocation3] sm:$0xff] %vm335_vm1, %v521_v63 }
 0x2ae   : > { %v520_v1 = vpop.xlane.xlu1 %519 }
 0x2af   : > { %v522_v2 = vadd.f32 %v520_v1, %v498_v0 }
 0x2b1   : > { %525 = vst.msk [vmem:[#allocation3 + $0x8] sm:$0xff] %vm335_vm1, %v522_v2 }
 0x2b2 PF: > { %530 = sbr.rel (!%p942_p10) target bundleno = 1129 (0x469), region = 44  ;;  %vm533_vm5 = vcmask (%p942_p10), 261120   ;;  %v854_v5 = vmov (%p942_p10), 0   ;;  %v531_v6 = vld [vmem:[#allocation2] sm:$0xff] (%p942_p10)  ;;  %v532_v9 = vld [vmem:[#allocation2 + $0x8] sm:$0xff] (%p942_p10) }
 0x2b3   : > { %v534_v3 = vsel (%p942_p10), %vm533_vm5, %v948_v21, -inf  ;;  %v537_v4 = vsel (%p942_p10), %vm533_vm5, %v950_v23, -inf  ;;  %812 = vset.pattern.permute.xlu1 (%p942_p10), %v854_v5  ;;  %813 = vset.pattern.permute.xlu0 (%p942_p10), %v854_v5 }
 0x2b4   : > { %535 = vmax.xlane.f32.xlu0 (%p942_p10), %v534_v3  ;;  %v542_v28 = vld [vmem:[#allocation3] sm:$0xff] (%p942_p10) }
 0x2b8   : > { %538 = vmax.xlane.f32.xlu0 (%p942_p10), %v537_v4 }
 0x341   : > { %v536_v7 = vpop.xlane.xlu0 %535 }
 0x342   : > { %v540_v8 = vmax.f32 %v531_v6, %v536_v7 }
 0x344   : > { %v544_v10 = vsub.f32 %v531_v6, %v540_v8  ;;  %579 = vst.msk [vmem:[#allocation2] sm:$0xff] %vm335_vm1, %v540_v8  ;;  %554 = vperm.xlu1 %812, %v540_v8  }
 0x345   : > { %v539_v11 = vpop.xlane.xlu0 %538 }
 0x346   : > { %v541_v12 = vmax.f32 %v532_v9, %v539_v11  ;;  %v546_v26 = vmul.f32 1.442695, %v544_v10 }
 0x348   : > { %v545_v13 = vsub.f32 %v532_v9, %v541_v12  ;;  %580 = vst.msk [vmem:[#allocation2 + $0x8] sm:$0xff] %vm335_vm1, %v541_v12  ;;  %559 = vperm.xlu1 %812, %v541_v12  }
 0x34a   : > { %v548_v27 = vmul.f32 1.442695, %v545_v13 }
 0x3c3   : > { %v555_v14 = vpop.permute.xlu1 %554 }
 0x3c4   : > { %v562_v15 = vsub.f32 %v948_v21, %v555_v14 }
 0x3c6   : > { %v564_v16 = vmul.f32 1.442695, %v562_v15 }
 0x3c7   : > { %v560_v17 = vpop.permute.xlu1 %559 }
 0x3c8   : > { %814 = vpow2.f32 %v564_v16  ;;  %v563_v18 = vsub.f32 %v950_v23, %v560_v17  ;;  %v543_v23 = vld [vmem:[#allocation3 + $0x8] sm:$0xff] }
 0x3ca   : > { %v566_v19 = vmul.f32 1.442695, %v563_v18 }
 0x3cc   : > { %816 = vpow2.f32 %v566_v19 }
 0x3cd   : > { %818 = vpow2.f32 %v546_v26 }
 0x3ce   : > { %820 = vpow2.f32 %v548_v27 }
 0x3d2   : > { %v815_v20 = vpop.eup %814 }
 0x3d3   : > { %v568_v22 = vsel %vm533_vm5, %v815_v20, 0.0 }
 0x3d4   : > { %569 = vadd.xlane.f32.xlu0 %v568_v22 }
 0x3d6   : > { %v817_v24 = vpop.eup %816 }
 0x3d7   : > { %v571_v25 = vsel %vm533_vm5, %v817_v24, 0.0  ;;  %v819_v21 = vpop.eup %818 }
 0x3d8   : > { %572 = vadd.xlane.f32.xlu1 %v571_v25  ;;  %v550_v29 = vmul.f32 %v819_v21, %v542_v28  ;;  %v821_v30 = vpop.eup %820 }
 0x3d9   : > { %v551_v33 = vmul.f32 %v821_v30, %v543_v23 }
 0x461   : > { %v570_v31 = vpop.xlane.xlu0 %569 }
 0x462   : > { %v574_v32 = vadd.f32 %v570_v31, %v550_v29 }
 0x464   : > { %577 = vst.msk [vmem:[#allocation3] sm:$0xff] %vm335_vm1, %v574_v32 }
 0x465   : > { %v573_v34 = vpop.xlane.xlu1 %572 }
 0x466   : > { %v575_v35 = vadd.f32 %v573_v34, %v551_v33 }
 0x468   : > { %578 = vst.msk [vmem:[#allocation3 + $0x8] sm:$0xff] %vm335_vm1, %v575_v35 }
 0x469 PF: > { %v584_v39 = vld [vmem:[#allocation2] sm:$0xff]  ;;  %v585_v42 = vld [vmem:[#allocation2 + $0x8] sm:$0xff] }
 0x46a   : > { %v594_v43 = vld [vmem:[#allocation4] sm:$0xff]  ;;  %v595_v46 = vld [vmem:[#allocation4 + $0x8] sm:$0xff] }
 0x46b   : > { %v586_v36 = vld [vmem:[#allocation3] sm:$0xff] }
 0x46c   : > { %822 = vlog2.f32 %v586_v36 }
 0x46f   : > { %v587_v37 = vld [vmem:[#allocation3 + $0x8] sm:$0xff] }
 0x470   : > { %824 = vlog2.f32 %v587_v37 }
 0x476   : > { %v823_v38 = vpop.eup %822 }
 0x477   : > { %v589_v41 = vmul.f32 0.6931472, %v823_v38 }
 0x479   : > { %v592_v45 = vadd.f32 %v589_v41, %v584_v39 }
 0x47a   : > { %v825_v40 = vpop.eup %824 }
 0x47b   : > { %v591_v44 = vmul.f32 0.6931472, %v825_v40  ;;  %v596_v48 = vsub.f32 %v592_v45, %v594_v43 }
 0x47d   : > { %v593_v47 = vadd.f32 %v591_v44, %v585_v42  ;;  %599 = vst.msk [vmem:[%s914_s4] sm:$0xff] %vm335_vm1, %v596_v48 }
 0x47f   : > { %v597_v49 = vsub.f32 %v593_v47, %v595_v46 }
 0x481   : > { %600 = vst.msk [vmem:[%s914_s4 + $0x8] sm:$0xff] %vm335_vm1, %v597_v49 }
 0x482 PF: > { %s13_s14 = sadd.s32 1, %s848_s14   ;;  %s996_s12 = smov %s844_s13 }
 0x483   : > { %p10_p11 = scmp.ge.s32.totalorder %s13_s14, 4   ;;  %s997_s13 = smov %s999_s15 }
 0x485   :  { %12 = sbr.rel (!%p10_p11) target bundleno = 2 (0x2), region = 84 }

</bundles_post_ra>
